<compile_context>
chip_gen: v6e
topology: v6e:2x2x1
jax: 0.10.0
libtpu: 0.0.40
codegen_flags: <defaults>
</compile_context>

<pallas_src>
import functools

import jax
import jax.numpy as jnp
import numpy as np
from jax.experimental import pallas as pl
from jax.experimental.pallas import tpu as pltpu


def _round_up(x, m):
    return ((x + m - 1) // m) * m


def _cdiv(a, b):
    return (a + b - 1) // b


@functools.lru_cache(maxsize=1)
def _chip_params():
    """Returns (target_tile_bytes, vmem_limit_bytes, min_grid_steps)."""
    vmem_cap = 64 * 1024 * 1024
    try:
        info = pltpu.get_tpu_info()
        vmem_cap = int(getattr(info, "vmem_capacity_bytes", vmem_cap))
    except Exception:
        pass
    if vmem_cap >= 100 * 1024 * 1024:
        # v5e / v6e class: 128 MiB VMEM, single TensorCore -> big tiles,
        # no minimum-step cap (megacore halving only hurts here).
        return 4 * 1024 * 1024, 64 * 1024 * 1024, 1
    # v7x class: 64 MiB VMEM per TC, 2 TCs -> smaller tiles, keep >= 8 grid
    # steps so both TensorCores get pipelined work.
    return 2 * 1024 * 1024, 40 * 1024 * 1024, 8


# ---------------------------------------------------------------------------
# channels_last kernels: rows on sublanes, channels on lanes
# ---------------------------------------------------------------------------
def _ln_last_kernel(x_ref, w_ref, b_ref, o_ref, *, eps):
    x = x_ref[...].astype(jnp.float32)                  # (tm, C)
    mean = jnp.mean(x, axis=-1, keepdims=True)
    xc = x - mean
    var = jnp.mean(xc * xc, axis=-1, keepdims=True)
    inv = jax.lax.rsqrt(var + eps)                      # EUP rsqrt (free slot)
    w = w_ref[...].astype(jnp.float32)                  # (1, C)
    b = b_ref[...].astype(jnp.float32)                  # (1, C)
    o_ref[...] = ((xc * inv) * w + b).astype(o_ref.dtype)


def _ln_last_folded_kernel(x_ref, m_ref, w_ref, b_ref, o_ref, *, eps):
    # x block is (tm, 128): k = 128 // C original rows folded per 128-lane row.
    # m is the (128, 128) block-diagonal averaging matrix: x @ m gives the
    # per-original-row mean broadcast back to every lane of its segment.
    # MXU is otherwise idle, so the two matmuls ride in free slots.
    x = x_ref[...].astype(jnp.float32)                  # (tm, 128)
    m = m_ref[...]                                       # (128, 128) f32
    mean = jnp.dot(x, m, precision=jax.lax.Precision.HIGHEST,
                   preferred_element_type=jnp.float32)
    xc = x - mean
    var = jnp.dot(xc * xc, m, precision=jax.lax.Precision.HIGHEST,
                  preferred_element_type=jnp.float32)
    inv = jax.lax.rsqrt(var + eps)
    w = w_ref[...].astype(jnp.float32)                  # (1, 128) = weight tiled k times
    b = b_ref[...].astype(jnp.float32)
    o_ref[...] = ((xc * inv) * w + b).astype(o_ref.dtype)


def _choose_row_tile(rows, lane_width, itemsize, target_bytes, min_steps):
    tm = target_bytes // (lane_width * max(itemsize, 1))
    tm = max(8, (tm // 8) * 8)
    tm = min(tm, _round_up(rows, 8))                    # never bigger than the array
    if min_steps > 1:                                   # keep both v7x TCs fed
        tm = min(tm, max(8, _round_up(_cdiv(rows, min_steps), 8)))
    return max(tm, 8)


def _layernorm_channels_last_2d(x2d, weight, bias, eps):
    rows, C = x2d.shape
    target, vmem_limit, min_steps = _chip_params()
    itemsize = x2d.dtype.itemsize

    fold = (C < 128) and (128 % C == 0) and (rows % (128 // C) == 0)
    if fold:
        k = 128 // C
        rows_f = rows // k
        xf = x2d.reshape(rows_f, 128)                   # free: contiguous view
        tm = _choose_row_tile(rows_f, 128, itemsize, target, min_steps)
        grid = (_cdiv(rows_f, tm),)
        lanes = jnp.arange(128, dtype=jnp.int32)
        seg = lanes // C
        m = jnp.where(seg[:, None] == seg[None, :], 1.0 / C, 0.0).astype(jnp.float32)
        w128 = jnp.tile(weight.reshape(1, C), (1, k))
        b128 = jnp.tile(bias.reshape(1, C), (1, k))
        kernel = functools.partial(_ln_last_folded_kernel, eps=eps)
        out = pl.pallas_call(
            kernel,
            out_shape=jax.ShapeDtypeStruct((rows_f, 128), x2d.dtype),
            grid_spec=pltpu.PrefetchScalarGridSpec(
                num_scalar_prefetch=0,
                grid=grid,
                in_specs=[
                    pl.BlockSpec((tm, 128), lambda i: (i, 0)),
                    pl.BlockSpec((128, 128), lambda i: (0, 0)),
                    pl.BlockSpec((1, 128), lambda i: (0, 0)),
                    pl.BlockSpec((1, 128), lambda i: (0, 0)),
                ],
                out_specs=pl.BlockSpec((tm, 128), lambda i: (i, 0)),
            ),
            compiler_params=pltpu.CompilerParams(
                dimension_semantics=("parallel",),
                vmem_limit_bytes=vmem_limit,
            ),
        )(xf, m, w128, b128)
        return out.reshape(rows, C)

    # Fallback: channels directly on lanes (dense when C % 128 == 0).
    lane_w = max(_round_up(C, 128), 128)                # VMEM lane padding for sizing
    tm = _choose_row_tile(rows, lane_w, itemsize, target, min_steps)
    grid = (_cdiv(rows, tm),)
    kernel = functools.partial(_ln_last_kernel, eps=eps)
    out = pl.pallas_call(
        kernel,
        out_shape=jax.ShapeDtypeStruct((rows, C), x2d.dtype),
        grid_spec=pltpu.PrefetchScalarGridSpec(
            num_scalar_prefetch=0,
            grid=grid,
            in_specs=[
                # TODO(synk): add pipeline_mode=pl.Buffered(3) here only if xprof
                # still shows exposed DMA at this block size.
                pl.BlockSpec((tm, C), lambda i: (i, 0)),
                pl.BlockSpec((1, C), lambda i: (0, 0)),
                pl.BlockSpec((1, C), lambda i: (0, 0)),
            ],
            out_specs=pl.BlockSpec((tm, C), lambda i: (i, 0)),
        ),
        compiler_params=pltpu.CompilerParams(
            dimension_semantics=("parallel",),
            vmem_limit_bytes=vmem_limit,
        ),
    )(x2d, weight.reshape(1, C), bias.reshape(1, C))
    return out


# ---------------------------------------------------------------------------
# channels_first: (B, C, H*W), normalize over C (sublanes) — transpose-free
# ---------------------------------------------------------------------------
def _ln_first_kernel(x_ref, w_ref, b_ref, o_ref, *, eps):
    x = x_ref[...].astype(jnp.float32)                  # (bt, C, tl)
    mean = jnp.mean(x, axis=1, keepdims=True)           # cross-sublane reduce (XLU)
    xc = x - mean
    var = jnp.mean(xc * xc, axis=1, keepdims=True)
    inv = jax.lax.rsqrt(var + eps)
    w = w_ref[...].astype(jnp.float32)[None]             # (1, C, 1)
    b = b_ref[...].astype(jnp.float32)[None]
    o_ref[...] = ((xc * inv) * w + b).astype(o_ref.dtype)  # lane-dense over H*W


def _choose_cf_tiles(B, C, HW, itemsize, target_bytes, min_steps):
    c_pad = _round_up(C, 8)
    if HW <= 256:
        # Small spatial maps: take the full lane dim and fold a batch tile in.
        # TODO(synk): when HW < 128 the stores are still lane-masked; a fully
        # dense layout would need a batch->lane relayout, not done here.
        tl = HW
        bytes_per_b = c_pad * _round_up(HW, 128) * itemsize
        bt = max(1, target_bytes // max(bytes_per_b, 1))
        bt = min(bt, B)
        if min_steps > 1:
            bt = min(bt, max(1, _cdiv(B, min_steps)))
        return bt, tl
    tl = target_bytes // (c_pad * max(itemsize, 1))
    tl = max(128, (tl // 128) * 128)
    tl = min(tl, _round_up(HW, 128))
    if min_steps > 1:
        hw_steps_needed = max(1, _cdiv(min_steps, B))
        tl = min(tl, max(128, _round_up(_cdiv(HW, hw_steps_needed), 128)))
    return 1, tl


def _layernorm_channels_first_3d(x3, weight, bias, eps):
    B, C, HW = x3.shape
    target, vmem_limit, min_steps = _chip_params()
    bt, tl = _choose_cf_tiles(B, C, HW, x3.dtype.itemsize, target, min_steps)
    grid = (_cdiv(B, bt), _cdiv(HW, tl))
    kernel = functools.partial(_ln_first_kernel, eps=eps)
    out = pl.pallas_call(
        kernel,
        out_shape=jax.ShapeDtypeStruct((B, C, HW), x3.dtype),
        grid_spec=pltpu.PrefetchScalarGridSpec(
            num_scalar_prefetch=0,
            grid=grid,
            in_specs=[
                pl.BlockSpec((bt, C, tl), lambda i, j: (i, 0, j)),
                pl.BlockSpec((C, 1), lambda i, j: (0, 0)),
                pl.BlockSpec((C, 1), lambda i, j: (0, 0)),
            ],
            out_specs=pl.BlockSpec((bt, C, tl), lambda i, j: (i, 0, j)),
        ),
        compiler_params=pltpu.CompilerParams(
            dimension_semantics=("parallel", "parallel"),
            vmem_limit_bytes=vmem_limit,
        ),
    )(x3, weight.reshape(C, 1), bias.reshape(C, 1))
    return out


# ---------------------------------------------------------------------------
# Public wrapper — matches models/utils.py::LayerNorm.forward
# ---------------------------------------------------------------------------
def layer_norm(x, weight, bias, eps=1e-6, data_format="channels_last"):
    if data_format not in ("channels_last", "channels_first"):
        raise NotImplementedError
    if data_format == "channels_last":
        orig_shape = x.shape
        C = orig_shape[-1]
        rows = int(np.prod(orig_shape[:-1]))
        out2d = _layernorm_channels_last_2d(x.reshape(rows, C), weight, bias, eps)
        return out2d.reshape(orig_shape)
    else:
        # (B, C, *spatial) -> (B, C, prod(spatial)); no NCHW<->NHWC transposes.
        B, C = x.shape[0], x.shape[1]
        HW = int(np.prod(x.shape[2:])) if len(x.shape) > 2 else 1
        out3 = _layernorm_channels_first_3d(x.reshape(B, C, HW), weight, bias, eps)
        return out3.reshape(x.shape)


def _reference(x, weight, bias, eps, data_format):
    if data_format == "channels_last":
        u = jnp.mean(x, axis=-1, keepdims=True)
        s = jnp.mean((x - u) ** 2, axis=-1, keepdims=True)
        return (x - u) / jnp.sqrt(s + eps) * weight + bias
    else:
        u = jnp.mean(x, axis=1, keepdims=True)
        s = jnp.mean((x - u) ** 2, axis=1, keepdims=True)
        xn = (x - u) / jnp.sqrt(s + eps)
        return weight[None, :, None, None] * xn + bias[None, :, None, None]


if __name__ == "__main__":
    key = jax.random.PRNGKey(0)
    k1, k2, k3, k4 = jax.random.split(key, 4)

    C = 32
    eps = 1e-6  # module default (eps=1e-06 in models/utils.py)
    weight = jnp.ones((C,), jnp.float32) + 0.1 * jax.random.normal(k3, (C,), jnp.float32)
    bias = jnp.zeros((C,), jnp.float32) + 0.1 * jax.random.normal(k4, (C,), jnp.float32)

    ln = jax.jit(layer_norm, static_argnums=(3, 4))

    # channels_last: (B, H, W, C) — exercises the folded (lane-dense) path.
    x_last = jax.random.normal(k1, (2, 8, 8, C), jnp.float32)
    y_last = ln(x_last, weight, bias, eps, "channels_last")
    jax.block_until_ready(y_last)
    ref_last = _reference(x_last, weight, bias, eps, "channels_last")
    assert np.allclose(np.asarray(y_last), np.asarray(ref_last), atol=5e-4), "channels_last mismatch"

    # channels_first: (B, C, H, W) — transpose-free path with batch folding.
    x_first = jax.random.normal(k2, (2, C, 8, 8), jnp.float32)
    y_first = ln(x_first, weight, bias, eps, "channels_first")
    jax.block_until_ready(y_first)
    ref_first = _reference(x_first, weight, bias, eps, "channels_first")
    assert np.allclose(np.asarray(y_first), np.asarray(ref_first), atol=5e-4), "channels_first mismatch"

    # ragged rows (not a multiple of the fold / tile): fallback path + partial-block clipping.
    x_odd = jax.random.normal(k1, (3, 5, 7, C), jnp.float32)
    y_odd = ln(x_odd, weight, bias, eps, "channels_last")
    jax.block_until_ready(y_odd)
    ref_odd = _reference(x_odd, weight, bias, eps, "channels_last")
    assert np.allclose(np.asarray(y_odd), np.asarray(ref_odd), atol=5e-4), "ragged-rows mismatch"

    # ragged spatial for channels_first: partial lane block clipping.
    x_odd_cf = jax.random.normal(k2, (2, C, 5, 7), jnp.float32)
    y_odd_cf = ln(x_odd_cf, weight, bias, eps, "channels_first")
    jax.block_until_ready(y_odd_cf)
    ref_odd_cf = _reference(x_odd_cf, weight, bias, eps, "channels_first")
    assert np.allclose(np.asarray(y_odd_cf), np.asarray(ref_odd_cf), atol=5e-4), "ragged-spatial mismatch"

    print("KERNEL_OK")
</pallas_src>

<mosaic_0001>
module attributes {stable_mosaic.version = 11 : i64} {
  func.func @_ln_last_folded_kernel(%arg0: i32, %arg1: memref<8x128xf32, #tpu.memory_space<vmem>>, %arg2: memref<128x128xf32, #tpu.memory_space<vmem>>, %arg3: memref<1x128xf32, #tpu.memory_space<vmem>>, %arg4: memref<1x128xf32, #tpu.memory_space<vmem>>, %arg5: memref<8x128xf32, #tpu.memory_space<vmem>>) attributes {dimension_semantics = [#tpu.dimension_semantics<parallel>], iteration_bounds = array<i64: 4>, scalar_prefetch = 0 : i64, scratch_operands = 0 : i64, tpu.core_type = #tpu.core_type<tc>, window_params = [{transform_indices = @transform_0, window_bounds = array<i64: 8, 128>}, {pipeline_mode = #tpu.pipeline_mode<synchronous>, transform_indices = @transform_1, window_bounds = array<i64: 128, 128>}, {pipeline_mode = #tpu.pipeline_mode<synchronous>, transform_indices = @transform_2, window_bounds = array<i64: 1, 128>}, {pipeline_mode = #tpu.pipeline_mode<synchronous>, transform_indices = @transform_3, window_bounds = array<i64: 1, 128>}, {transform_indices = @transform_4, window_bounds = array<i64: 8, 128>}]} {
    %c0 = arith.constant 0 : index
    %c0_0 = arith.constant 0 : index
    %0 = vector.load %arg1[%c0, %c0_0] : memref<8x128xf32, #tpu.memory_space<vmem>>, vector<8x128xf32>
    %c0_1 = arith.constant 0 : index
    %c0_2 = arith.constant 0 : index
    %1 = vector.load %arg2[%c0_1, %c0_2] : memref<128x128xf32, #tpu.memory_space<vmem>>, vector<128x128xf32>
    %cst = arith.constant dense<0.000000e+00> : vector<8x128xf32>
    %2 = tpu.matmul %0, %1, %cst {dimension_numbers = #tpu.dot_dimension_numbers<[1], [0], [0], [1], [0, 0, 1, 1], [], []>, precision = #tpu.contract_precision<fp32>} : vector<8x128xf32>, vector<128x128xf32>, vector<8x128xf32> -> vector<8x128xf32>
    %3 = arith.subf %0, %2 : vector<8x128xf32>
    %4 = arith.mulf %3, %3 : vector<8x128xf32>
    %cst_3 = arith.constant dense<0.000000e+00> : vector<8x128xf32>
    %5 = tpu.matmul %4, %1, %cst_3 {dimension_numbers = #tpu.dot_dimension_numbers<[1], [0], [0], [1], [0, 0, 1, 1], [], []>, precision = #tpu.contract_precision<fp32>} : vector<8x128xf32>, vector<128x128xf32>, vector<8x128xf32> -> vector<8x128xf32>
    %cst_4 = arith.constant 9.99999997E-7 : f32
    %6 = vector.broadcast %cst_4 : f32 to vector<8x128xf32>
    %7 = arith.addf %5, %6 : vector<8x128xf32>
    %8 = math.rsqrt %7 : vector<8x128xf32>
    %c0_5 = arith.constant 0 : index
    %c0_6 = arith.constant 0 : index
    %9 = vector.load %arg3[%c0_5, %c0_6] : memref<1x128xf32, #tpu.memory_space<vmem>>, vector<1x128xf32>
    %c0_7 = arith.constant 0 : index
    %c0_8 = arith.constant 0 : index
    %10 = vector.load %arg4[%c0_7, %c0_8] : memref<1x128xf32, #tpu.memory_space<vmem>>, vector<1x128xf32>
    %11 = arith.mulf %3, %8 : vector<8x128xf32>
    %12 = vector.broadcast %9 : vector<1x128xf32> to vector<8x128xf32>
    %13 = arith.mulf %11, %12 : vector<8x128xf32>
    %14 = vector.broadcast %10 : vector<1x128xf32> to vector<8x128xf32>
    %15 = arith.addf %13, %14 : vector<8x128xf32>
    %c0_9 = arith.constant 0 : index
    %c0_10 = arith.constant 0 : index
    %16 = vector.load %arg5[%c0_9, %c0_10] : memref<8x128xf32, #tpu.memory_space<vmem>>, vector<8x128xf32>
    tpu.vector_store %arg5[%c0_9, %c0_10], %15 {strides = array<i32>} : memref<8x128xf32, #tpu.memory_space<vmem>>, vector<8x128xf32>,
    return
  }
  func.func @transform_0(%arg0: i32) -> (i32, i32) {
    %c0_i32 = arith.constant 0 : i32
    %c0_i32_0 = arith.constant 0 : i32
    return %arg0, %c0_i32 : i32, i32
  }
  func.func @transform_1(%arg0: i32) -> (i32, i32) {
    %c0_i32 = arith.constant 0 : i32
    %c0_i32_0 = arith.constant 0 : i32
    %c0_i32_1 = arith.constant 0 : i32
    return %c0_i32, %c0_i32_0 : i32, i32
  }
  func.func @transform_2(%arg0: i32) -> (i32, i32) {
    %c0_i32 = arith.constant 0 : i32
    %c0_i32_0 = arith.constant 0 : i32
    %c0_i32_1 = arith.constant 0 : i32
    return %c0_i32, %c0_i32_0 : i32, i32
  }
  func.func @transform_3(%arg0: i32) -> (i32, i32) {
    %c0_i32 = arith.constant 0 : i32
    %c0_i32_0 = arith.constant 0 : i32
    %c0_i32_1 = arith.constant 0 : i32
    return %c0_i32, %c0_i32_0 : i32, i32
  }
  func.func @transform_4(%arg0: i32) -> (i32, i32) {
    %c0_i32 = arith.constant 0 : i32
    %c0_i32_0 = arith.constant 0 : i32
    return %arg0, %c0_i32 : i32, i32
  }
}

</mosaic_0001>

<bundles_post_ra>
// kernel: layer_norm.1
= control target key start
LH: loop header
LB: loop body
LE: loop exit
PB: predicated region body
PF: predicated region fallthrough
CT: control target
= control target key end

     0   :  { %s2248_s15 = smov 0   ;;  %s2972_s0 = inlined_call_operand.vmem [shape: f32[32,128], index: 0, kind: input, shape index: {}]   ;;  %s2973_s1 = inlined_call_operand.vmem [shape: f32[128,128], index: 1, kind: input, shape index: {}]   ;;  %s2974_s2 = inlined_call_operand.vmem [shape: f32[1,128], index: 2, kind: input, shape index: {}]   ;;  %s2975_s3 = inlined_call_operand.vmem [shape: f32[1,128], index: 3, kind: input, shape index: {}]   ;;  %s2976_s4 = inlined_call_operand.vmem [shape: f32[32,128], index: 4, kind: output, shape index: {}]  }
   0x1 LB: > { %s1566_s16 = sadd.s32 4294967295, %s2219_s15   ;;  %p1570_p0 = scmp.ge.s32.totalorder %s2219_s15, 1  ;;  %s2219_s15 = sphi %s2248_s15, %s14_s15  }
   0x2   : > { %p161_p1 = scmp.lt.s32.totalorder %s2219_s15, 5 }
   0x4   : > { %p162_p2 = pnand %p1570_p0, %p161_p1 }
   0x6   : > { %165 = sbr.rel (%p162_p2) target bundleno = 614 (0x266), region = 36 }
   0xb   : > { %v209_v0 = vld [vmem:[%s2973_s1 + $0x78] sm:$0xff]  ;;  %v208_v1 = vld [vmem:[%s2973_s1 + $0x70] sm:$0xff]  ;;  %v207_v2 = vld [vmem:[%s2973_s1 + $0x68] sm:$0xff]  ;;  %p2267_p3 = scmp.lt.s32.totalorder %s1566_s16, 3  ;;  %v2221_v3 = vmov 0.0   ;;  %vm2222_vm0 = vmmov 0  }
   0xc   : > { %1781 = vmatprep.subr.mxu0 %v2221_v3  ;;  %v2272_v4 = vand.u32 4294901760, %v209_v0  ;;  %v2274_v5 = vand.u32 4294901760, %v208_v1  ;;  %v2276_v6 = vand.u32 4294901760, %v207_v2  ;;  %v206_v7 = vld [vmem:[%s2973_s1 + $0x60] sm:$0xff]  ;;  %1816 = vmatprep.subr.mxu1 %v2221_v3  ;;  %v205_v8 = vld [vmem:[%s2973_s1 + $0x58] sm:$0xff]  ;;  %v204_v9 = vld [vmem:[%s2973_s1 + $0x50] sm:$0xff] }
   0xd   : > { %v2288_v10 = vand.u32 4294901760, %v206_v7  ;;  %v2290_v11 = vand.u32 4294901760, %v205_v8  ;;  %v2292_v12 = vand.u32 4294901760, %v204_v9  ;;  %v203_v13 = vld [vmem:[%s2973_s1 + $0x48] sm:$0xff]  ;;  %v202_v14 = vld [vmem:[%s2973_s1 + $0x40] sm:$0xff]  ;;  %1813 = vmatprep.mubr.msk.f32.mxu0 %vm2222_vm0, %v2221_v3  ;;  %1848 = vmatprep.mubr.msk.f32.mxu1 %vm2222_vm0, %v2221_v3  ;;  %v201_v19 = vld [vmem:[%s2973_s1 + $0x38] sm:$0xff] }
   0xe   : > { %1782 = vmatpush3.msra.mxu0 %v2272_v4  ;;  %v2306_v15 = vsub.f32 %v209_v0, %v2272_v4  ;;  %v2309_v16 = vsub.f32 %v208_v1, %v2274_v5  ;;  %v2311_v17 = vand.u32 4294901760, %v203_v13  ;;  %v2314_v18 = vsub.f32 %v207_v2, %v2276_v6  ;;  %s3017_s16 = smov (!%p2267_p3, %s1566_s16), 3  ;;  %v200_v26 = vld [vmem:[%s2973_s1 + $0x30] sm:$0xff]  ;;  %v199_v36 = vld [vmem:[%s2973_s1 + $0x28] sm:$0xff]  ;;  %v198_v41 = vld [vmem:[%s2973_s1 + $0x20] sm:$0xff] }
   0xf   : > { %1783 = vmatprep.subr.mxu0 %v2221_v3  ;;  %v2327_v20 = vsub.f32 %v206_v7, %v2288_v10  ;;  %v2330_v21 = vsub.f32 %v205_v8, %v2290_v11  ;;  %v2342_v25 = vand.u32 4294901760, %v202_v14  ;;  %v2351_v28 = vand.u32 4294901760, %v201_v19  ;;  %s1571_s12 = sshll.u32 %s3017_s16, 3  ;;  %v197_v49 = vld [vmem:[%s2973_s1 + $0x18] sm:$0xff]  ;;  %v196_v54 = vld [vmem:[%s2973_s1 + $0x10] sm:$0xff]  ;;  %v195_v60 = vld [vmem:[%s2973_s1 + $0x8] sm:$0xff] }
  0x10   : > { %1784 = vmatpush3.msra.mxu0 %v2274_v5  ;;  %v2334_v22 = vand.u32 4294901760, %v2306_v15  ;;  %v2337_v23 = vand.u32 4294901760, %v2309_v16  ;;  %v2340_v24 = vand.u32 4294901760, %v2314_v18  ;;  %v2357_v30 = vsub.f32 %v204_v9, %v2292_v12  ;;  %s188_s21 = scalar_lea.vmem %s2972_s0, %s1571_s12  ;;  %v194_v7 = vld [vmem:[%s2973_s1] sm:$0xff]  ;;  %s192_s10 = scalar_lea.vmem %s2976_s4, %s1571_s12 }
  0x11   : > { %1785 = vmatprep.subr.mxu0 %v2221_v3  ;;  %v2349_v27 = vand.u32 4294901760, %v2327_v20  ;;  %v2354_v29 = vand.u32 4294901760, %v2330_v21  ;;  %v2368_v34 = vsub.f32 %v203_v13, %v2311_v17  ;;  %v2371_v35 = vand.u32 4294901760, %v200_v26  ;;  %v2419_v50 = vld [vmem:[%s188_s21] sm:$0xff] }
  0x12   : > { %1786 = vmatpush3.msra.mxu0 %v2276_v6  ;;  %v305_v31 = vsub.f32 %v2306_v15, %v2334_v22  ;;  %v312_v32 = vsub.f32 %v2309_v16, %v2337_v23  ;;  %v319_v33 = vsub.f32 %v2314_v18, %v2340_v24  ;;  %v2384_v40 = vand.u32 4294901760, %v2357_v30  ;;  %2990 = vst [vmem:[#allocation2_spill] sm:$0xff] %v2419_v50 }
  0x13   : > { %1787 = vmatprep.subr.mxu0 %v2221_v3  ;;  %v326_v39 = vsub.f32 %v2327_v20, %v2349_v27  ;;  %v333_v42 = vsub.f32 %v2330_v21, %v2354_v29  ;;  %v2398_v43 = vsub.f32 %v202_v14, %v2342_v25  ;;  %v2404_v45 = vand.u32 4294901760, %v199_v36 }
  0x14   : > { %1788 = vmatpush3.msra.mxu0 %v2288_v10  ;;  %v2377_v37 = vand.u32 4294901760, %v305_v31  ;;  %v2379_v38 = vand.u32 4294901760, %v312_v32  ;;  %v2402_v44 = vand.u32 4294901760, %v319_v33  ;;  %v2407_v46 = vand.u32 4294901760, %v2368_v34 }
  0x15   : > { %1789 = vmatprep.subr.mxu0 %v2221_v3  ;;  %v2410_v47 = vsub.f32 %v201_v19, %v2351_v28  ;;  %v2414_v48 = vand.u32 4294901760, %v198_v41  ;;  %v2423_v51 = vand.u32 4294901760, %v326_v39  ;;  %v340_v52 = vsub.f32 %v2357_v30, %v2384_v40 }
  0x16   : > { %1790 = vmatpush3.msra.mxu0 %v2290_v11  ;;  %1817 = vmatpush3.msra.mxu1 %v2377_v37  ;;  %v2428_v53 = vand.u32 4294901760, %v2398_v43  ;;  %v2434_v55 = vsub.f32 %v200_v26, %v2371_v35  ;;  %v2438_v56 = vand.u32 4294901760, %v333_v42  ;;  %v347_v58 = vsub.f32 %v2368_v34, %v2407_v46 }
  0x17   : > { %1791 = vmatprep.subr.mxu0 %v2221_v3  ;;  %1818 = vmatprep.subr.mxu1 %v2221_v3  ;;  %2991 = vst [vmem:[#allocation3_spill] sm:$0xff] %v2423_v51  ;;  %v2441_v57 = vand.u32 4294901760, %v2410_v47  ;;  %v2447_v59 = vand.u32 4294901760, %v197_v49  ;;  %v2453_v61 = vsub.f32 %v199_v36, %v2404_v45  ;;  %v2456_v62 = vand.u32 4294901760, %v2419_v50 }
  0x18   : > { %1792 = vmatpush3.msra.mxu0 %v2292_v12  ;;  %1819 = vmatpush3.msra.mxu1 %v2379_v38  ;;  %2992 = vst [vmem:[#allocation4_spill] sm:$0xff] %v2438_v56  ;;  %v2460_v63 = vand.u32 4294901760, %v196_v54  ;;  %v2464_v0 = vand.u32 4294901760, %v340_v52  ;;  %v354_v1 = vsub.f32 %v2398_v43, %v2428_v53  ;;  %v2469_v2 = vand.u32 4294901760, %v2434_v55 }
  0x19   : > { %1793 = vmatprep.subr.mxu0 %v2221_v3  ;;  %1820 = vmatprep.subr.mxu1 %v2221_v3  ;;  %v2475_v8 = vsub.f32 %v198_v41, %v2414_v48  ;;  %v361_v9 = vsub.f32 %v2410_v47, %v2441_v57  ;;  %v2481_v13 = vand.u32 4294901760, %v195_v60  ;;  %v2485_v14 = vand.u32 4294901760, %v347_v58 }
  0x1a   : > { %1794 = vmatpush3.msra.mxu0 %v2311_v17  ;;  %1821 = vmatpush3.msra.mxu1 %v2402_v44  ;;  %2993 = vst [vmem:[#allocation5_spill] sm:$0xff] %v2464_v0  ;;  %v2488_v19 = vand.u32 4294901760, %v2453_v61  ;;  %v2492_v26 = vsub.f32 %v2419_v50, %v2456_v62  ;;  %v2495_v31 = vsub.f32 %v197_v49, %v2447_v59  ;;  %v2499_v32 = vand.u32 4294901760, %v194_v7 }
  0x1b   : > { %1795 = vmatprep.subr.mxu0 %v2221_v3  ;;  %1822 = vmatprep.subr.mxu1 %v2221_v3  ;;  %2994 = vst [vmem:[#allocation6_spill] sm:$0xff] %v2485_v14  ;;  %v2503_v33 = vand.u32 4294901760, %v354_v1  ;;  %v368_v36 = vsub.f32 %v2434_v55, %v2469_v2  ;;  %v2508_v39 = vand.u32 4294901760, %v2475_v8  ;;  %v2511_v41 = vsub.f32 %v196_v54, %v2460_v63 }
  0x1c   : > { %1796 = vmatpush3.msra.mxu0 %v2342_v25  ;;  %1823 = vmatpush3.msra.mxu1 %v2423_v51  ;;  %v2515_v42 = vand.u32 4294901760, %v361_v9  ;;  %v375_v49 = vsub.f32 %v2453_v61, %v2488_v19  ;;  %v2523_v58 = vand.u32 4294901760, %v2495_v31  ;;  %v2526_v54 = vsub.f32 %v195_v60, %v2481_v13 }
  0x1d   : > { %1797 = vmatprep.subr.mxu0 %v2221_v3  ;;  %1824 = vmatprep.subr.mxu1 %v2221_v3  ;;  %2995 = vst [vmem:[#allocation7_spill] sm:$0xff] %v2503_v33  ;;  %v2532_v1 = vand.u32 4294901760, %v368_v36  ;;  %v382_v9 = vsub.f32 %v2475_v8, %v2508_v39  ;;  %v2537_v52 = vand.u32 4294901760, %v2511_v41  ;;  %v2540_v50 = vsub.f32 %v194_v7, %v2499_v32 }
  0x1e   : > { %1798 = vmatpush3.msra.mxu0 %v2351_v28  ;;  %1825 = vmatpush3.msra.mxu1 %v2438_v56  ;;  %2996 = vst [vmem:[#allocation8_spill] sm:$0xff] %v2515_v42  ;;  %2997 = vst [vmem:[#allocation9_spill] sm:$0xff] %v2523_v58  ;;  %v2546_v60 = vand.u32 4294901760, %v375_v49  ;;  %v3000_v36 = vand.u32 4294901760, %v2492_v26  ;;  %v2554_v7 = vand.u32 4294901760, %v2526_v54 }
  0x1f   : > { %1799 = vmatprep.subr.mxu0 %v2221_v3  ;;  %1826 = vmatprep.subr.mxu1 %v2221_v3  ;;  %2998 = vst [vmem:[#allocation10_spill] sm:$0xff] %v2532_v1  ;;  %2999 = vst [vmem:[#allocation11_spill] sm:$0xff] %v2537_v52  ;;  %v2560_v49 = vand.u32 4294901760, %v382_v9 }
  0x20   : > { %1800 = vmatpush3.msra.mxu0 %v2371_v35  ;;  %1827 = vmatpush3.msra.mxu1 %v2464_v0  ;;  %3001 = vst [vmem:[#allocation12_spill] sm:$0xff] %v2554_v7  ;;  %v403_v9 = vsub.f32 %v2526_v54, %v2554_v7 }
  0x21   : > { %1801 = vmatprep.subr.mxu0 %v2221_v3  ;;  %1828 = vmatprep.subr.mxu1 %v2221_v3 }
  0x22   : > { %1802 = vmatpush3.msra.mxu0 %v2404_v45  ;;  %1829 = vmatpush3.msra.mxu1 %v2485_v14  ;;  %v389_v14 = vsub.f32 %v2495_v31, %v2523_v58 }
  0x23   : > { %1803 = vmatprep.subr.mxu0 %v2221_v3  ;;  %1830 = vmatprep.subr.mxu1 %v2221_v3 }
  0x24   : > { %1804 = vmatpush3.msra.mxu0 %v2414_v48  ;;  %1831 = vmatpush3.msra.mxu1 %v2503_v33  ;;  %v294_v33 = vsub.f32 %v2492_v26, %v3000_v36  ;;  %v2565_v36 = vand.u32 4294901760, %v2540_v50  ;;  %v2571_v56 = vand.u32 4294901760, %v389_v14  ;;  %v2586_v14 = vand.u32 4294901760, %v403_v9 }
  0x25   : > { %1805 = vmatprep.subr.mxu0 %v2221_v3  ;;  %1832 = vmatprep.subr.mxu1 %v2221_v3 }
  0x26   : > { %1806 = vmatpush3.msra.mxu0 %v2447_v59  ;;  %1833 = vmatpush3.msra.mxu1 %v2515_v42  ;;  %v396_v42 = vsub.f32 %v2511_v41, %v2537_v52  ;;  %3002 = vst [vmem:[#allocation13_spill] sm:$0xff] %v2565_v36  ;;  %v295_v0 = vand.u32 4294901760, %v294_v33  ;;  %v410_v51 = vsub.f32 %v2540_v50, %v2565_v36 }
  0x27   : > { %1807 = vmatprep.subr.mxu0 %v2221_v3  ;;  %1834 = vmatprep.subr.mxu1 %v2221_v3 }
  0x28   : > { %1808 = vmatpush3.msra.mxu0 %v2460_v63  ;;  %1835 = vmatpush3.msra.mxu1 %v2532_v1  ;;  %v2579_v1 = vand.u32 4294901760, %v396_v42  ;;  %v2592_v33 = vand.u32 4294901760, %v410_v51  ;;  %v3003_v51 = vand.u32 4294901760, %v2492_v26  ;;  %v3010_v42 = vld [vmem:[#allocation10_spill] sm:$0xff] }
  0x29   : > { %1809 = vmatprep.subr.mxu0 %v2221_v3  ;;  %1836 = vmatprep.subr.mxu1 %v2221_v3 }
  0x2a   : > { %1810 = vmatpush3.msra.mxu0 %v2481_v13  ;;  %1837 = vmatpush3.msra.mxu1 %v2546_v60 }
  0x2b   : > { %1811 = vmatprep.subr.mxu0 %v2221_v3  ;;  %1838 = vmatprep.subr.mxu1 %v2221_v3 }
  0x2c   : > { %1812 = vmatpush3.msra.mxu0 %v2499_v32  ;;  %1839 = vmatpush3.msra.mxu1 %v2560_v49 }
  0x2d   : > { %1840 = vmatprep.subr.mxu1 %v2221_v3  ;;  %1851 = vmatprep.subr.mxu0 %v2221_v3 }
  0x2e   : > { %1814 = vmatmul.mubr.f32.vlgmr.msra.gmra.mxu0 %v295_v0  ;;  %1841 = vmatpush3.msra.mxu1 %v2571_v56  ;;  %v3008_v0 = vld [vmem:[#allocation7_spill] sm:$0xff] }
  0x2f   : > { %1852 = vmatpush3.msra.mxu0 %v2306_v15  ;;  %1842 = vmatprep.subr.mxu1 %v2221_v3 }
  0x30   : > { %1853 = vmatprep.subr.mxu0 %v2221_v3  ;;  %1843 = vmatpush3.msra.mxu1 %v2579_v1 }
  0x31   : > { %1854 = vmatpush3.msra.mxu0 %v2309_v16  ;;  %1844 = vmatprep.subr.mxu1 %v2221_v3 }
  0x32   : > { %1855 = vmatprep.subr.mxu0 %v2221_v3  ;;  %1845 = vmatpush3.msra.mxu1 %v2586_v14 }
  0x33   : > { %1856 = vmatpush3.msra.mxu0 %v2314_v18  ;;  %1846 = vmatprep.subr.mxu1 %v2221_v3 }
  0x34   : > { %1857 = vmatprep.subr.mxu0 %v2221_v3  ;;  %1847 = vmatpush3.msra.mxu1 %v2592_v33 }
  0x35   : > { %1858 = vmatpush3.msra.mxu0 %v2327_v20  ;;  %1849 = vmatmul.mubr.f32.vlgmr.msra.gmra.mxu1 %v2456_v62 }
  0x36   : > { %1859 = vmatprep.subr.mxu0 %v2221_v3  ;;  %1886 = vmatprep.subr.mxu1 %v2221_v3 }
  0x37   : > { %1860 = vmatpush3.msra.mxu0 %v2330_v21  ;;  %1887 = vmatpush3.msra.mxu1 %v2272_v4 }
  0x38   : > { %1861 = vmatprep.subr.mxu0 %v2221_v3  ;;  %1888 = vmatprep.subr.mxu1 %v2221_v3 }
  0x39   : > { %1862 = vmatpush3.msra.mxu0 %v2357_v30  ;;  %1889 = vmatpush3.msra.mxu1 %v2274_v5 }
  0x3a   : > { %1863 = vmatprep.subr.mxu0 %v2221_v3  ;;  %1890 = vmatprep.subr.mxu1 %v2221_v3 }
  0x3b   : > { %1864 = vmatpush3.msra.mxu0 %v2368_v34  ;;  %1891 = vmatpush3.msra.mxu1 %v2276_v6 }
  0x3c   : > { %1865 = vmatprep.subr.mxu0 %v2221_v3  ;;  %1892 = vmatprep.subr.mxu1 %v2221_v3 }
  0x3d   : > { %1866 = vmatpush3.msra.mxu0 %v2398_v43  ;;  %1893 = vmatpush3.msra.mxu1 %v2288_v10 }
  0x3e   : > { %1867 = vmatprep.subr.mxu0 %v2221_v3  ;;  %1894 = vmatprep.subr.mxu1 %v2221_v3 }
  0x3f   : > { %1868 = vmatpush3.msra.mxu0 %v2410_v47  ;;  %1895 = vmatpush3.msra.mxu1 %v2290_v11 }
  0x40   : > { %1869 = vmatprep.subr.mxu0 %v2221_v3  ;;  %1896 = vmatprep.subr.mxu1 %v2221_v3 }
  0x41   : > { %1870 = vmatpush3.msra.mxu0 %v2434_v55  ;;  %1897 = vmatpush3.msra.mxu1 %v2292_v12 }
  0x42   : > { %1871 = vmatprep.subr.mxu0 %v2221_v3  ;;  %1898 = vmatprep.subr.mxu1 %v2221_v3 }
  0x43   : > { %1872 = vmatpush3.msra.mxu0 %v2453_v61  ;;  %1899 = vmatpush3.msra.mxu1 %v2311_v17 }
  0x44   : > { %1873 = vmatprep.subr.mxu0 %v2221_v3  ;;  %1900 = vmatprep.subr.mxu1 %v2221_v3 }
  0x45   : > { %1874 = vmatpush3.msra.mxu0 %v2475_v8  ;;  %1901 = vmatpush3.msra.mxu1 %v2342_v25 }
  0x46   : > { %1875 = vmatprep.subr.mxu0 %v2221_v3  ;;  %1902 = vmatprep.subr.mxu1 %v2221_v3 }
  0x47   : > { %1876 = vmatpush3.msra.mxu0 %v2495_v31  ;;  %1903 = vmatpush3.msra.mxu1 %v2351_v28 }
  0x48   : > { %1877 = vmatprep.subr.mxu0 %v2221_v3  ;;  %1904 = vmatprep.subr.mxu1 %v2221_v3 }
  0x49   : > { %1878 = vmatpush3.msra.mxu0 %v2511_v41  ;;  %1905 = vmatpush3.msra.mxu1 %v2371_v35 }
  0x4a   : > { %1879 = vmatprep.subr.mxu0 %v2221_v3  ;;  %1906 = vmatprep.subr.mxu1 %v2221_v3 }
  0x4b   : > { %1880 = vmatpush3.msra.mxu0 %v2526_v54  ;;  %1907 = vmatpush3.msra.mxu1 %v2404_v45 }
  0x4c   : > { %1881 = vmatprep.subr.mxu0 %v2221_v3  ;;  %1908 = vmatprep.subr.mxu1 %v2221_v3 }
  0x4d   : > { %1882 = vmatpush3.msra.mxu0 %v2540_v50  ;;  %1883 = vmatprep.mubr.msk.f32.mxu0 %vm2222_vm0, %v2221_v3 }
  0x4e   : > { %1909 = vmatpush3.msra.mxu1 %v2414_v48  ;;  %1884 = vmatmul.mubr.f32.vlgmr.msra.gmra.mxu0 %v2492_v26  ;;  %v3009_v26 = vld [vmem:[#allocation8_spill] sm:$0xff] }
  0x4f   : > { %1910 = vmatprep.subr.mxu1 %v2221_v3  ;;  %1921 = vmatprep.subr.mxu0 %v2221_v3 }
  0x50   : > { %1911 = vmatpush3.msra.mxu1 %v2447_v59  ;;  %1922 = vmatpush3.msra.mxu0 %v2334_v22 }
  0x51   : > { %1912 = vmatprep.subr.mxu1 %v2221_v3  ;;  %1923 = vmatprep.subr.mxu0 %v2221_v3 }
  0x52   : > { %1913 = vmatpush3.msra.mxu1 %v2460_v63  ;;  %1924 = vmatpush3.msra.mxu0 %v2337_v23 }
  0x53   : > { %1914 = vmatprep.subr.mxu1 %v2221_v3  ;;  %1925 = vmatprep.subr.mxu0 %v2221_v3 }
  0x54   : > { %1915 = vmatpush3.msra.mxu1 %v2481_v13  ;;  %1926 = vmatpush3.msra.mxu0 %v2340_v24 }
  0x55   : > { %1916 = vmatprep.subr.mxu1 %v2221_v3  ;;  %1927 = vmatprep.subr.mxu0 %v2221_v3 }
  0x56   : > { %1917 = vmatpush3.msra.mxu1 %v2499_v32  ;;  %1918 = vmatprep.mubr.msk.f32.mxu1 %vm2222_vm0, %v2221_v3 }
  0x57   : > { %1928 = vmatpush3.msra.mxu0 %v2349_v27  ;;  %1919 = vmatmul.mubr.f32.vlgmr.msra.gmra.mxu1 %v3003_v51 }
  0x58   : > { %1929 = vmatprep.subr.mxu0 %v2221_v3  ;;  %1956 = vmatprep.subr.mxu1 %v2221_v3 }
  0x59   : > { %1930 = vmatpush3.msra.mxu0 %v2354_v29  ;;  %1957 = vmatpush3.msra.mxu1 %v2272_v4 }
  0x5a   : > { %1931 = vmatprep.subr.mxu0 %v2221_v3  ;;  %1958 = vmatprep.subr.mxu1 %v2221_v3 }
  0x5b   : > { %1932 = vmatpush3.msra.mxu0 %v2384_v40  ;;  %1959 = vmatpush3.msra.mxu1 %v2274_v5 }
  0x5c   : > { %1933 = vmatprep.subr.mxu0 %v2221_v3  ;;  %1960 = vmatprep.subr.mxu1 %v2221_v3 }
  0x5d   : > { %1934 = vmatpush3.msra.mxu0 %v2407_v46  ;;  %1961 = vmatpush3.msra.mxu1 %v2276_v6 }
  0x5e   : > { %1935 = vmatprep.subr.mxu0 %v2221_v3  ;;  %1962 = vmatprep.subr.mxu1 %v2221_v3 }
  0x5f   : > { %1936 = vmatpush3.msra.mxu0 %v2428_v53  ;;  %1963 = vmatpush3.msra.mxu1 %v2288_v10 }
  0x60   : > { %1937 = vmatprep.subr.mxu0 %v2221_v3  ;;  %1964 = vmatprep.subr.mxu1 %v2221_v3 }
  0x61   : > { %1938 = vmatpush3.msra.mxu0 %v2441_v57  ;;  %1965 = vmatpush3.msra.mxu1 %v2290_v11 }
  0x62   : > { %1939 = vmatprep.subr.mxu0 %v2221_v3  ;;  %1966 = vmatprep.subr.mxu1 %v2221_v3 }
  0x63   : > { %1940 = vmatpush3.msra.mxu0 %v2469_v2  ;;  %1967 = vmatpush3.msra.mxu1 %v2292_v12 }
  0x64   : > { %1941 = vmatprep.subr.mxu0 %v2221_v3  ;;  %1968 = vmatprep.subr.mxu1 %v2221_v3 }
  0x65   : > { %1942 = vmatpush3.msra.mxu0 %v2488_v19  ;;  %1969 = vmatpush3.msra.mxu1 %v2311_v17 }
  0x66   : > { %1943 = vmatprep.subr.mxu0 %v2221_v3  ;;  %1970 = vmatprep.subr.mxu1 %v2221_v3 }
  0x67   : > { %1944 = vmatpush3.msra.mxu0 %v2508_v39  ;;  %1971 = vmatpush3.msra.mxu1 %v2342_v25 }
  0x68   : > { %1945 = vmatprep.subr.mxu0 %v2221_v3  ;;  %1972 = vmatprep.subr.mxu1 %v2221_v3 }
  0x69   : > { %1946 = vmatpush3.msra.mxu0 %v2523_v58  ;;  %1973 = vmatpush3.msra.mxu1 %v2351_v28 }
  0x6a   : > { %1947 = vmatprep.subr.mxu0 %v2221_v3  ;;  %1974 = vmatprep.subr.mxu1 %v2221_v3 }
  0x6b   : > { %1948 = vmatpush3.msra.mxu0 %v2537_v52  ;;  %1975 = vmatpush3.msra.mxu1 %v2371_v35 }
  0x6c   : > { %1949 = vmatprep.subr.mxu0 %v2221_v3  ;;  %1976 = vmatprep.subr.mxu1 %v2221_v3 }
  0x6d   : > { %1950 = vmatpush3.msra.mxu0 %v2554_v7  ;;  %1977 = vmatpush3.msra.mxu1 %v2404_v45 }
  0x6e   : > { %1951 = vmatprep.subr.mxu0 %v2221_v3  ;;  %1978 = vmatprep.subr.mxu1 %v2221_v3 }
  0x6f   : > { %1952 = vmatpush3.msra.mxu0 %v2565_v36  ;;  %1953 = vmatprep.mubr.msk.f32.mxu0 %vm2222_vm0, %v2221_v3 }
  0x70   : > { %1979 = vmatpush3.msra.mxu1 %v2414_v48  ;;  %1954 = vmatmul.mubr.f32.vlgmr.msra.gmra.mxu0 %v2456_v62 }
  0x71   : > { %1980 = vmatprep.subr.mxu1 %v2221_v3  ;;  %1988 = vmatprep.mubr.msk.f32.mxu1 %vm2222_vm0, %v2221_v3 }
  0x72   : > { %1981 = vmatpush3.msra.mxu1 %v2447_v59  ;;  %1991 = vmatprep.subr.mxu0 %v2221_v3 }
  0x73   : > { %1982 = vmatprep.subr.mxu1 %v2221_v3  ;;  %1992 = vmatpush3.msra.mxu0 %v2272_v4 }
  0x74   : > { %1983 = vmatpush3.msra.mxu1 %v2460_v63  ;;  %1993 = vmatprep.subr.mxu0 %v2221_v3 }
  0x75   : > { %1984 = vmatprep.subr.mxu1 %v2221_v3  ;;  %1994 = vmatpush3.msra.mxu0 %v2274_v5 }
  0x76   : > { %1985 = vmatpush3.msra.mxu1 %v2481_v13  ;;  %1995 = vmatprep.subr.mxu0 %v2221_v3 }
  0x77   : > { %1986 = vmatprep.subr.mxu1 %v2221_v3  ;;  %1996 = vmatpush3.msra.mxu0 %v2276_v6 }
  0x78   : > { %1987 = vmatpush3.msra.mxu1 %v2499_v32  ;;  %1997 = vmatprep.subr.mxu0 %v2221_v3 }
  0x79   : > { %1989 = vmatmul.mubr.f32.vlgmr.msra.gmra.mxu1 %v2456_v62  ;;  %2026 = vmatprep.subr.mxu1 %v2221_v3  ;;  %v3007_v62 = vld [vmem:[#allocation6_spill] sm:$0xff] }
  0x7a   : > { %2027 = vmatpush3.msra.mxu1 %v2377_v37  ;;  %1998 = vmatpush3.msra.mxu0 %v2288_v10  ;;  %v3004_v37 = vld [vmem:[#allocation3_spill] sm:$0xff] }
  0x7b   : > { %2028 = vmatprep.subr.mxu1 %v2221_v3  ;;  %1999 = vmatprep.subr.mxu0 %v2221_v3 }
  0x7c   : > { %2029 = vmatpush3.msra.mxu1 %v2379_v38  ;;  %2000 = vmatpush3.msra.mxu0 %v2290_v11  ;;  %v3005_v38 = vld [vmem:[#allocation4_spill] sm:$0xff] }
  0x7d   : > { %2030 = vmatprep.subr.mxu1 %v2221_v3  ;;  %2001 = vmatprep.subr.mxu0 %v2221_v3 }
  0x7e   : > { %2031 = vmatpush3.msra.mxu1 %v2402_v44  ;;  %2002 = vmatpush3.msra.mxu0 %v2292_v12  ;;  %v3006_v44 = vld [vmem:[#allocation5_spill] sm:$0xff] }
  0x7f   : > { %2032 = vmatprep.subr.mxu1 %v2221_v3  ;;  %2003 = vmatprep.subr.mxu0 %v2221_v3 }
  0x80   : > { %2033 = vmatpush3.msra.mxu1 %v3004_v37  ;;  %2004 = vmatpush3.msra.mxu0 %v2311_v17 }
  0x81   : > { %2034 = vmatprep.subr.mxu1 %v2221_v3  ;;  %2005 = vmatprep.subr.mxu0 %v2221_v3 }
  0x82   : > { %2035 = vmatpush3.msra.mxu1 %v3005_v38  ;;  %2006 = vmatpush3.msra.mxu0 %v2342_v25 }
  0x83   : > { %2036 = vmatprep.subr.mxu1 %v2221_v3  ;;  %2007 = vmatprep.subr.mxu0 %v2221_v3 }
  0x84   : > { %2037 = vmatpush3.msra.mxu1 %v3006_v44  ;;  %2008 = vmatpush3.msra.mxu0 %v2351_v28 }
  0x85   : > { %2038 = vmatprep.subr.mxu1 %v2221_v3  ;;  %2009 = vmatprep.subr.mxu0 %v2221_v3 }
  0x86   : > { %2039 = vmatpush3.msra.mxu1 %v3007_v62  ;;  %2010 = vmatpush3.msra.mxu0 %v2371_v35 }
  0x87   : > { %2040 = vmatprep.subr.mxu1 %v2221_v3  ;;  %2011 = vmatprep.subr.mxu0 %v2221_v3 }
  0x88   : > { %2041 = vmatpush3.msra.mxu1 %v3008_v0  ;;  %2012 = vmatpush3.msra.mxu0 %v2404_v45 }
  0x89   : > { %2042 = vmatprep.subr.mxu1 %v2221_v3  ;;  %2013 = vmatprep.subr.mxu0 %v2221_v3 }
  0x8a   : > { %2043 = vmatpush3.msra.mxu1 %v3009_v26  ;;  %2014 = vmatpush3.msra.mxu0 %v2414_v48 }
  0x8b   : > { %2044 = vmatprep.subr.mxu1 %v2221_v3  ;;  %2015 = vmatprep.subr.mxu0 %v2221_v3 }
  0x8c   : > { %2045 = vmatpush3.msra.mxu1 %v3010_v42  ;;  %2058 = vmatprep.mubr.msk.f32.mxu1 %vm2222_vm0, %v2221_v3 }
  0x8d   : > { %2046 = vmatprep.subr.mxu1 %v2221_v3  ;;  %2016 = vmatpush3.msra.mxu0 %v2447_v59 }
  0x8e   : > { %2047 = vmatpush3.msra.mxu1 %v2546_v60  ;;  %2017 = vmatprep.subr.mxu0 %v2221_v3 }
  0x8f   : > { %2048 = vmatprep.subr.mxu1 %v2221_v3  ;;  %2018 = vmatpush3.msra.mxu0 %v2460_v63 }
  0x90   : > { %2049 = vmatpush3.msra.mxu1 %v2560_v49  ;;  %2019 = vmatprep.subr.mxu0 %v2221_v3 }
  0x91   : > { %2050 = vmatprep.subr.mxu1 %v2221_v3  ;;  %2020 = vmatpush3.msra.mxu0 %v2481_v13 }
  0x92   : > { %2051 = vmatpush3.msra.mxu1 %v2571_v56  ;;  %2021 = vmatprep.subr.mxu0 %v2221_v3 }
  0x93   : > { %2052 = vmatprep.subr.mxu1 %v2221_v3  ;;  %2022 = vmatpush3.msra.mxu0 %v2499_v32 }
  0x94   : > { %2053 = vmatpush3.msra.mxu1 %v2579_v1  ;;  %2023 = vmatprep.mubr.msk.f32.mxu0 %vm2222_vm0, %v2221_v3 }
  0x95   : > { %2054 = vmatprep.subr.mxu1 %v2221_v3  ;;  %2061 = vmatprep.subr.mxu0 %v2221_v3 }
  0x96   : > { %2055 = vmatpush3.msra.mxu1 %v2586_v14 }
  0x97   : > { %2056 = vmatprep.subr.mxu1 %v2221_v3 }
  0x98   : > { %2057 = vmatpush3.msra.mxu1 %v2592_v33  ;;  %v3011_v33 = vld [vmem:[#allocation2_spill] sm:$0xff] }
  0x99   : > { %2096 = vmatprep.subr.mxu1 %v2221_v3 }
  0xee   : > { %v297_v56 = vpop.f32.mrf.mxu0 }
  0xf0   : > { %v1815_v60 = vpop.f32.mrf.mxu0 }
  0xf5   : > { %v448_v49 = vpop.f32.mrf.mxu1 }
  0xf6   : > { %v449_v62 = vadd.f32 %v448_v49, %v297_v56 }
  0xf7   : > { %v1850_v9 = vpop.f32.mrf.mxu1 }
 0x10e   : > { %v552_v1 = vpop.f32.mrf.mxu0 }
 0x10f   : > { %v553_v26 = vadd.f32 %v552_v1, %v449_v62 }
 0x110   : > { %v1885_v51 = vpop.f32.mrf.mxu0 }
 0x117   : > { %v641_v37 = vpop.f32.mrf.mxu1 }
 0x118   : > { %v642_v42 = vadd.f32 %v641_v37, %v553_v26 }
 0x119   : > { %v1920_v38 = vpop.f32.mrf.mxu1 }
 0x130   : > { %v760_v44 = vpop.f32.mrf.mxu0 }
 0x131   : > { %v761_v14 = vadd.f32 %v760_v44, %v642_v42 }
 0x132   : > { %v1955_v0 = vpop.f32.mrf.mxu0 }
 0x139   : > { %v847_v36 = vpop.f32.mrf.mxu1 }
 0x13a   : > { %v848_v7 = vadd.f32 %v847_v36, %v761_v14 }
 0x13b   : > { %v1990_v52 = vpop.f32.mrf.mxu1 }
 0x13c   : > { %v2808_v58 = vsub.f32 %v3011_v33, %v848_v7 }
 0x13e   : > { %v852_v60 = vmul.f32 %v2808_v58, %v2808_v58 }
 0x140   : > { %v2812_v9 = vand.u32 4294901760, %v852_v60 }
 0x142   : > { %v2815_v51 = vsub.f32 %v852_v60, %v2812_v9  ;;  %2059 = vmatmul.mubr.f32.vlgmr.msra.gmra.mxu1 %v2812_v9 }
 0x143   : > { %2097 = vmatpush3.msra.mxu1 %v2272_v4  ;;  %2128 = vmatprep.mubr.msk.f32.mxu1 %vm2222_vm0, %v2221_v3 }
 0x144   : > { %2098 = vmatprep.subr.mxu1 %v2221_v3  ;;  %v936_v52 = vand.u32 4294901760, %v2815_v51 }
 0x145   : > { %2099 = vmatpush3.msra.mxu1 %v2274_v5 }
 0x146   : > { %2100 = vmatprep.subr.mxu1 %v2221_v3  ;;  %v937_v7 = vsub.f32 %v2815_v51, %v936_v52 }
 0x147   : > { %2101 = vmatpush3.msra.mxu1 %v2276_v6 }
 0x148   : > { %2102 = vmatprep.subr.mxu1 %v2221_v3  ;;  %v938_v36 = vand.u32 4294901760, %v937_v7 }
 0x149   : > { %2103 = vmatpush3.msra.mxu1 %v2288_v10 }
 0x14a   : > { %2104 = vmatprep.subr.mxu1 %v2221_v3  ;;  %2024 = vmatmul.mubr.f32.vlgmr.msra.gmra.mxu0 %v938_v36 }
 0x14b   : > { %2062 = vmatpush3.msra.mxu0 %v2306_v15  ;;  %2105 = vmatpush3.msra.mxu1 %v2290_v11 }
 0x14c   : > { %2063 = vmatprep.subr.mxu0 %v2221_v3  ;;  %2106 = vmatprep.subr.mxu1 %v2221_v3 }
 0x14d   : > { %2064 = vmatpush3.msra.mxu0 %v2309_v16  ;;  %2107 = vmatpush3.msra.mxu1 %v2292_v12 }
 0x14e   : > { %2065 = vmatprep.subr.mxu0 %v2221_v3  ;;  %2108 = vmatprep.subr.mxu1 %v2221_v3 }
 0x14f   : > { %2066 = vmatpush3.msra.mxu0 %v2314_v18  ;;  %2109 = vmatpush3.msra.mxu1 %v2311_v17 }
 0x150   : > { %2067 = vmatprep.subr.mxu0 %v2221_v3  ;;  %2110 = vmatprep.subr.mxu1 %v2221_v3 }
 0x151   : > { %2068 = vmatpush3.msra.mxu0 %v2327_v20  ;;  %2111 = vmatpush3.msra.mxu1 %v2342_v25 }
 0x152   : > { %2069 = vmatprep.subr.mxu0 %v2221_v3  ;;  %2112 = vmatprep.subr.mxu1 %v2221_v3 }
 0x153   : > { %2070 = vmatpush3.msra.mxu0 %v2330_v21  ;;  %2113 = vmatpush3.msra.mxu1 %v2351_v28 }
 0x154   : > { %2071 = vmatprep.subr.mxu0 %v2221_v3  ;;  %2114 = vmatprep.subr.mxu1 %v2221_v3 }
 0x155   : > { %2072 = vmatpush3.msra.mxu0 %v2357_v30  ;;  %2115 = vmatpush3.msra.mxu1 %v2371_v35 }
 0x156   : > { %2073 = vmatprep.subr.mxu0 %v2221_v3  ;;  %2116 = vmatprep.subr.mxu1 %v2221_v3 }
 0x157   : > { %2074 = vmatpush3.msra.mxu0 %v2368_v34  ;;  %2117 = vmatpush3.msra.mxu1 %v2404_v45 }
 0x158   : > { %2075 = vmatprep.subr.mxu0 %v2221_v3  ;;  %2118 = vmatprep.subr.mxu1 %v2221_v3 }
 0x159   : > { %2076 = vmatpush3.msra.mxu0 %v2398_v43  ;;  %2119 = vmatpush3.msra.mxu1 %v2414_v48 }
 0x15a   : > { %2077 = vmatprep.subr.mxu0 %v2221_v3  ;;  %2120 = vmatprep.subr.mxu1 %v2221_v3 }
 0x15b   : > { %2078 = vmatpush3.msra.mxu0 %v2410_v47  ;;  %2121 = vmatpush3.msra.mxu1 %v2447_v59 }
 0x15c   : > { %2079 = vmatprep.subr.mxu0 %v2221_v3  ;;  %2122 = vmatprep.subr.mxu1 %v2221_v3 }
 0x15d   : > { %2080 = vmatpush3.msra.mxu0 %v2434_v55  ;;  %2123 = vmatpush3.msra.mxu1 %v2460_v63 }
 0x15e   : > { %2081 = vmatprep.subr.mxu0 %v2221_v3  ;;  %2124 = vmatprep.subr.mxu1 %v2221_v3 }
 0x15f   : > { %2082 = vmatpush3.msra.mxu0 %v2453_v61  ;;  %2125 = vmatpush3.msra.mxu1 %v2481_v13 }
 0x160   : > { %2083 = vmatprep.subr.mxu0 %v2221_v3  ;;  %2126 = vmatprep.subr.mxu1 %v2221_v3 }
 0x161   : > { %2084 = vmatpush3.msra.mxu0 %v2475_v8  ;;  %2127 = vmatpush3.msra.mxu1 %v2499_v32 }
 0x162   : > { %2085 = vmatprep.subr.mxu0 %v2221_v3  ;;  %2129 = vmatmul.mubr.f32.vlgmr.msra.gmra.mxu1 %v936_v52 }
 0x163   : > { %2166 = vmatprep.subr.mxu1 %v2221_v3  ;;  %2086 = vmatpush3.msra.mxu0 %v2495_v31 }
 0x164   : > { %2167 = vmatpush3.msra.mxu1 %v2272_v4  ;;  %2087 = vmatprep.subr.mxu0 %v2221_v3  ;;  %v3012_v4 = vld [vmem:[#allocation9_spill] sm:$0xff] }
 0x165   : > { %2168 = vmatprep.subr.mxu1 %v2221_v3  ;;  %2088 = vmatpush3.msra.mxu0 %v2511_v41 }
 0x166   : > { %2169 = vmatpush3.msra.mxu1 %v2274_v5  ;;  %2089 = vmatprep.subr.mxu0 %v2221_v3  ;;  %v3013_v5 = vld [vmem:[#allocation11_spill] sm:$0xff] }
 0x167   : > { %2170 = vmatprep.subr.mxu1 %v2221_v3  ;;  %2090 = vmatpush3.msra.mxu0 %v2526_v54 }
 0x168   : > { %2171 = vmatpush3.msra.mxu1 %v2276_v6  ;;  %2091 = vmatprep.subr.mxu0 %v2221_v3  ;;  %v3014_v6 = vld [vmem:[#allocation12_spill] sm:$0xff] }
 0x169   : > { %2172 = vmatprep.subr.mxu1 %v2221_v3  ;;  %2092 = vmatpush3.msra.mxu0 %v2540_v50 }
 0x16a   : > { %2093 = vmatprep.mubr.msk.f32.mxu0 %vm2222_vm0, %v2221_v3  ;;  %2173 = vmatpush3.msra.mxu1 %v2288_v10  ;;  %v3015_v10 = vld [vmem:[#allocation13_spill] sm:$0xff] }
 0x16b   : > { %2094 = vmatmul.mubr.f32.vlgmr.msra.gmra.mxu0 %v2815_v51  ;;  %2131 = vmatprep.subr.mxu0 %v2221_v3 }
 0x16c   : > { %2174 = vmatprep.subr.mxu1 %v2221_v3  ;;  %2132 = vmatpush3.msra.mxu0 %v2334_v22 }
 0x16d   : > { %2175 = vmatpush3.msra.mxu1 %v2290_v11  ;;  %2133 = vmatprep.subr.mxu0 %v2221_v3 }
 0x16e   : > { %2176 = vmatprep.subr.mxu1 %v2221_v3  ;;  %2134 = vmatpush3.msra.mxu0 %v2337_v23 }
 0x16f   : > { %2177 = vmatpush3.msra.mxu1 %v2292_v12  ;;  %2135 = vmatprep.subr.mxu0 %v2221_v3 }
 0x170   : > { %2178 = vmatprep.subr.mxu1 %v2221_v3  ;;  %2136 = vmatpush3.msra.mxu0 %v2340_v24 }
 0x171   : > { %2179 = vmatpush3.msra.mxu1 %v2311_v17  ;;  %2137 = vmatprep.subr.mxu0 %v2221_v3 }
 0x172   : > { %2180 = vmatprep.subr.mxu1 %v2221_v3  ;;  %2138 = vmatpush3.msra.mxu0 %v2349_v27 }
 0x173   : > { %2181 = vmatpush3.msra.mxu1 %v2342_v25  ;;  %2139 = vmatprep.subr.mxu0 %v2221_v3 }
 0x174   : > { %2182 = vmatprep.subr.mxu1 %v2221_v3  ;;  %2140 = vmatpush3.msra.mxu0 %v2354_v29 }
 0x175   : > { %2183 = vmatpush3.msra.mxu1 %v2351_v28  ;;  %2141 = vmatprep.subr.mxu0 %v2221_v3 }
 0x176   : > { %2184 = vmatprep.subr.mxu1 %v2221_v3  ;;  %2142 = vmatpush3.msra.mxu0 %v2384_v40  ;;  %v1573_v40 = vld [vmem:[%s2974_s2] ss:$0 sm:$0xff] }
 0x177   : > { %2185 = vmatpush3.msra.mxu1 %v2371_v35  ;;  %2143 = vmatprep.subr.mxu0 %v2221_v3 }
 0x178   : > { %2186 = vmatprep.subr.mxu1 %v2221_v3  ;;  %2144 = vmatpush3.msra.mxu0 %v2407_v46 }
 0x179   : > { %2187 = vmatpush3.msra.mxu1 %v2404_v45  ;;  %2145 = vmatprep.subr.mxu0 %v2221_v3  ;;  %v1574_v45 = vld [vmem:[%s2975_s3] ss:$0 sm:$0xff] }
 0x17a   : > { %2188 = vmatprep.subr.mxu1 %v2221_v3  ;;  %2146 = vmatpush3.msra.mxu0 %v2428_v53 }
 0x17b   : > { %2189 = vmatpush3.msra.mxu1 %v2414_v48  ;;  %2147 = vmatprep.subr.mxu0 %v2221_v3 }
 0x17c   : > { %2190 = vmatprep.subr.mxu1 %v2221_v3  ;;  %2148 = vmatpush3.msra.mxu0 %v2441_v57 }
 0x17d   : > { %2191 = vmatpush3.msra.mxu1 %v2447_v59  ;;  %2149 = vmatprep.subr.mxu0 %v2221_v3 }
 0x17e   : > { %2192 = vmatprep.subr.mxu1 %v2221_v3  ;;  %2150 = vmatpush3.msra.mxu0 %v2469_v2 }
 0x17f   : > { %2193 = vmatpush3.msra.mxu1 %v2460_v63  ;;  %2151 = vmatprep.subr.mxu0 %v2221_v3 }
 0x180   : > { %2194 = vmatprep.subr.mxu1 %v2221_v3  ;;  %2152 = vmatpush3.msra.mxu0 %v2488_v19 }
 0x181   : > { %2195 = vmatpush3.msra.mxu1 %v2481_v13  ;;  %2153 = vmatprep.subr.mxu0 %v2221_v3 }
 0x182   : > { %2196 = vmatprep.subr.mxu1 %v2221_v3  ;;  %2154 = vmatpush3.msra.mxu0 %v2508_v39 }
 0x183   : > { %2197 = vmatpush3.msra.mxu1 %v2499_v32  ;;  %2198 = vmatprep.mubr.msk.f32.mxu1 %vm2222_vm0, %v2221_v3 }
 0x184   : > { %2155 = vmatprep.subr.mxu0 %v2221_v3  ;;  %2199 = vmatmul.mubr.f32.vlgmr.msra.gmra.mxu1 %v2812_v9 }
 0x185   : > { %2156 = vmatpush3.msra.mxu0 %v3012_v4  ;;  %2163 = vmatprep.mubr.msk.f32.mxu0 %vm2222_vm0, %v2221_v3 }
 0x186   : > { %2157 = vmatprep.subr.mxu0 %v2221_v3 }
 0x187   : > { %2158 = vmatpush3.msra.mxu0 %v3013_v5 }
 0x188   : > { %2159 = vmatprep.subr.mxu0 %v2221_v3 }
 0x189   : > { %2160 = vmatpush3.msra.mxu0 %v3014_v6 }
 0x18a   : > { %2161 = vmatprep.subr.mxu0 %v2221_v3 }
 0x18b   : > { %2162 = vmatpush3.msra.mxu0 %v3015_v10 }
 0x18c   : > { %2164 = vmatmul.mubr.f32.vlgmr.msra.gmra.mxu0 %v2812_v9 }
 0x202   : > { %v1091_v11 = vpop.f32.mrf.mxu1 }
 0x204   : > { %v2060_v12 = vpop.f32.mrf.mxu1 }
 0x20a   : > { %v940_v15 = vpop.f32.mrf.mxu0 }
 0x20b   : > { %v941_v22 = vadd.f32 1e-06, %v940_v15 }
 0x20c   : > { %v2025_v16 = vpop.f32.mrf.mxu0 }
 0x20d   : > { %v1092_v24 = vadd.f32 %v1091_v11, %v941_v22 }
 0x222   : > { %v1284_v17 = vpop.f32.mrf.mxu1 }
 0x224   : > { %v2130_v18 = vpop.f32.mrf.mxu1 }
 0x22b   : > { %v1195_v20 = vpop.f32.mrf.mxu0 }
 0x22c   : > { %v1196_v27 = vadd.f32 %v1195_v20, %v1092_v24 }
 0x22d   : > { %v2095_v21 = vpop.f32.mrf.mxu0 }
 0x22e   : > { %v1285_v28 = vadd.f32 %v1284_v17, %v1196_v27 }
 0x244   : > { %v1490_v23 = vpop.f32.mrf.mxu1 }
 0x246   : > { %v2200_v25 = vpop.f32.mrf.mxu1 }
 0x24c   : > { %v1403_v3 = vpop.f32.mrf.mxu0 }
 0x24d   : > { %v1404_v29 = vadd.f32 %v1403_v3, %v1285_v28 }
 0x24e   : > { %v2165_v30 = vpop.f32.mrf.mxu0 }
 0x24f   : > { %v1491_v34 = vadd.f32 %v1490_v23, %v1404_v29 }
 0x251   : > { %2211 = vrsqrt.f32 %v1491_v34 }
 0x25e   : > { %v2212_v35 = vpop.eup %2211 }
 0x25f   : > { %v1497_v43 = vmul.f32 %v2212_v35, %v2808_v58 }
 0x261   : > { %v1504_v46 = vmul.f32 %v1573_v40, %v1497_v43 }
 0x263   : > { %v1511_v47 = vadd.f32 %v1574_v45, %v1504_v46 }
 0x265   : > { %1512 = vst [vmem:[%s192_s10] sm:$0xff] %v1511_v47 }
 0x266 PF: > { %s14_s15 = sadd.s32 1, %s2219_s15  }
 0x267   : > { %p11_p4 = scmp.ge.s32.totalorder %s14_s15, 6  }
 0x269   :  { %13 = sbr.rel (!%p11_p4) target bundleno = 1 (0x1), region = 66 }

</bundles_post_ra>
